<compile_context>
chip_gen: v5e
topology: v5e:2x2
jax: 0.10.0
libtpu: 0.0.40
codegen_flags: <defaults>
</compile_context>

<pallas_src>
import math

import numpy as np

import jax
import jax.numpy as jnp
from jax.experimental import pallas as pl

# ---- problem sizes (small, consistent with the module) ----
SEQ = 8       # sequence length
BATCH = 2     # batch size
D_MODEL = 32  # embedding dim
N_HEAD = 4    # number of attention heads
D_HEAD = D_MODEL // N_HEAD
D_FF = 4 * D_MODEL
LN_EPS = 1e-5
SB = SEQ * BATCH          # rows of the flattened activation
HSB = N_HEAD * SB         # rows of the head-stacked score matrix

# ---- row layout of the packed width-32 parameter slab (all offsets % 8 == 0) ----
R_WQ = 0                       # (D_MODEL, D_MODEL)  W_q^T, pre-scaled by 1/sqrt(D_HEAD)
R_WK = 32                      # (D_MODEL, D_MODEL)  W_k^T
R_WV = 64                      # (D_MODEL, D_MODEL)  W_v^T
R_WOUT = 96                    # (D_MODEL, D_MODEL)  W_out^T
R_WPROJ = 128                  # (D_FF,    D_MODEL)  W_proj^T
R_HMASK = 256                  # (HSB,     D_MODEL)  per-head lane mask (0/1)
R_LN1G = 320
R_LN1B = 328
R_LN2G = 336
R_LN2B = 344
R_BQ = 352                     # pre-scaled by 1/sqrt(D_HEAD)
R_BK = 360
R_BV = 368
R_BOUT = 376
R_BPROJ = 384
ROWS32 = 392                   # multiple of 8

# ---- row layout of the width-128 (D_FF) slab ----
R_BFC = 32                     # rows 0:32 = W_fc^T, row 32 = b_fc
ROWS_FC = 40


def _layer_norm(x, gamma, beta):
    # x: (R, D) fp32, gamma/beta: (1, D) fp32
    mu = jnp.mean(x, axis=-1, keepdims=True)
    xc = x - mu
    var = jnp.mean(xc * xc, axis=-1, keepdims=True)
    return xc * jax.lax.rsqrt(var + LN_EPS) * gamma + beta


def rab_kernel(x_ref, amask_ref, w32_ref, wfc_ref, o_ref):
    x = x_ref[...].astype(jnp.float32)                          # (SB, D)

    # ---------------- attention branch ----------------
    h1 = _layer_norm(x, w32_ref[R_LN1G:R_LN1G + 1, :], w32_ref[R_LN1B:R_LN1B + 1, :])

    # q/k/v projections.  The 1/sqrt(D_HEAD) scale is folded into W_q / b_q at
    # parameter-prep time, so no per-call scaling anywhere.
    q = jnp.dot(h1, w32_ref[R_WQ:R_WQ + D_MODEL, :],
                preferred_element_type=jnp.float32) + w32_ref[R_BQ:R_BQ + 1, :]
    k = jnp.dot(h1, w32_ref[R_WK:R_WK + D_MODEL, :],
                preferred_element_type=jnp.float32) + w32_ref[R_BK:R_BK + 1, :]
    v = jnp.dot(h1, w32_ref[R_WV:R_WV + D_MODEL, :],
                preferred_element_type=jnp.float32) + w32_ref[R_BV:R_BV + 1, :]

    # Head-batched attention with heads stacked along the sublane (row) axis:
    # row h*SB + r of `qs` is q[r] with all lanes outside head h zeroed, so a
    # single matmul against k^T yields every head's (SB, SB) score block
    # stacked along rows.  No 3-D relayouts, no lane slicing.
    hmask = w32_ref[R_HMASK:R_HMASK + HSB, :]                   # (HSB, D) 0/1
    qs = jnp.concatenate([q] * N_HEAD, axis=0) * hmask          # (HSB, D)

    s = jnp.dot(qs, k.T, preferred_element_type=jnp.float32)    # (HSB, SB)
    s = s + amask_ref[...]                                      # same-batch additive mask
    s = s - jnp.max(s, axis=-1, keepdims=True)
    p = jnp.exp(s)
    p = p * pl.reciprocal(jnp.sum(p, axis=-1, keepdims=True), approx=True)

    # Attend (all heads in one matmul), keep only each head's own lanes, then
    # sum the per-head row blocks back into the concatenated-heads layout.
    of = jnp.dot(p, v, preferred_element_type=jnp.float32) * hmask   # (HSB, D)
    o = of[0:SB, :]
    for h in range(1, N_HEAD):                                  # 3 VPU adds, 16-aligned
        o = o + of[h * SB:(h + 1) * SB, :]

    attn = jnp.dot(o, w32_ref[R_WOUT:R_WOUT + D_MODEL, :],
                   preferred_element_type=jnp.float32) + w32_ref[R_BOUT:R_BOUT + 1, :]
    x = x + attn

    # ---------------- MLP branch ----------------
    h2 = _layer_norm(x, w32_ref[R_LN2G:R_LN2G + 1, :], w32_ref[R_LN2B:R_LN2B + 1, :])
    f = jnp.dot(h2, wfc_ref[0:D_MODEL, :],
                preferred_element_type=jnp.float32) + wfc_ref[R_BFC:R_BFC + 1, :]
    f = f * jax.nn.sigmoid(1.702 * f)                           # QuickGELU
    f = jnp.dot(f, w32_ref[R_WPROJ:R_WPROJ + D_FF, :],
                preferred_element_type=jnp.float32) + w32_ref[R_BPROJ:R_BPROJ + 1, :]

    # Single store.  D_MODEL=32 < 128 lanes -> masked vst; negligible at (16, 32).
    o_ref[...] = (x + f).astype(o_ref.dtype)


def prepare_params(params):
    """One-time packing (call OUTSIDE jit, once per parameter set).

    Folds the attention scale into W_q / b_q and packs the 12 small tensors +
    the per-head lane mask into two contiguous slabs, so the kernel receives 4
    input DMAs instead of 13."""
    scale = 1.0 / math.sqrt(D_HEAD)
    w_in_t = params["w_in_t"]                                    # (D, 3D)
    b_in = params["b_in"]                                        # (1, 3D)

    slab32 = jnp.zeros((ROWS32, D_MODEL), jnp.float32)
    slab32 = slab32.at[R_WQ:R_WQ + D_MODEL].set(w_in_t[:, 0 * D_MODEL:1 * D_MODEL] * scale)
    slab32 = slab32.at[R_WK:R_WK + D_MODEL].set(w_in_t[:, 1 * D_MODEL:2 * D_MODEL])
    slab32 = slab32.at[R_WV:R_WV + D_MODEL].set(w_in_t[:, 2 * D_MODEL:3 * D_MODEL])
    slab32 = slab32.at[R_WOUT:R_WOUT + D_MODEL].set(params["w_out_t"])
    slab32 = slab32.at[R_WPROJ:R_WPROJ + D_FF].set(params["w_proj_t"])

    # Per-head lane mask: row h*SB + r keeps only lanes [h*D_HEAD, (h+1)*D_HEAD).
    lane = np.arange(D_MODEL)[None, :]
    head = np.repeat(np.arange(N_HEAD), SB)[:, None]
    hmask = ((lane // D_HEAD) == head).astype(np.float32)        # (HSB, D)
    slab32 = slab32.at[R_HMASK:R_HMASK + HSB].set(jnp.asarray(hmask))

    slab32 = slab32.at[R_LN1G:R_LN1G + 1].set(params["ln1_g"])
    slab32 = slab32.at[R_LN1B:R_LN1B + 1].set(params["ln1_b"])
    slab32 = slab32.at[R_LN2G:R_LN2G + 1].set(params["ln2_g"])
    slab32 = slab32.at[R_LN2B:R_LN2B + 1].set(params["ln2_b"])
    slab32 = slab32.at[R_BQ:R_BQ + 1].set(b_in[:, 0 * D_MODEL:1 * D_MODEL] * scale)
    slab32 = slab32.at[R_BK:R_BK + 1].set(b_in[:, 1 * D_MODEL:2 * D_MODEL])
    slab32 = slab32.at[R_BV:R_BV + 1].set(b_in[:, 2 * D_MODEL:3 * D_MODEL])
    slab32 = slab32.at[R_BOUT:R_BOUT + 1].set(params["b_out"])
    slab32 = slab32.at[R_BPROJ:R_BPROJ + 1].set(params["b_proj"])

    slab_fc = jnp.zeros((ROWS_FC, D_FF), jnp.float32)
    slab_fc = slab_fc.at[0:D_MODEL].set(params["w_fc_t"])
    slab_fc = slab_fc.at[R_BFC:R_BFC + 1].set(params["b_fc"])

    # Additive same-batch mask (rows are seq-major: batch(row) = row % BATCH),
    # pre-tiled over heads so the kernel applies it with one broadcast-free add.
    r = np.arange(SB)
    same = (r[:, None] % BATCH) == (r[None, :] % BATCH)
    amask = np.where(same, 0.0, -1e30).astype(np.float32)        # (SB, SB)
    amask = np.tile(amask, (N_HEAD, 1))                          # (HSB, SB)

    return {"slab32": slab32, "slab_fc": slab_fc, "attn_mask": jnp.asarray(amask)}


@jax.jit
def residual_attention_block(x_sbd, slab32, slab_fc, attn_mask):
    """x_sbd: (seq, batch, d_model) — PyTorch nn.MultiheadAttention layout."""
    S, B, D = x_sbd.shape
    # Free contiguous reshape (no transpose): rows are (s, b) pairs, seq-major.
    x2 = x_sbd.reshape(S * B, D)

    # Single kernel invocation, no grid: activations + packed weights (<300 KiB
    # of VMEM) fit on v5e/v6e/v7x, so every array is a whole-array block.
    out = pl.pallas_call(
        rab_kernel,
        out_shape=jax.ShapeDtypeStruct((S * B, D), x_sbd.dtype),
    )(x2, attn_mask, slab32, slab_fc)

    return out.reshape(S, B, D)


# ------------------- pure-JAX reference (for a correctness check) -------------------
def reference(x_sbd, params):
    def ln(x, g, b):
        mu = jnp.mean(x, axis=-1, keepdims=True)
        var = jnp.mean((x - mu) ** 2, axis=-1, keepdims=True)
        return (x - mu) * jax.lax.rsqrt(var + LN_EPS) * g + b

    x = jnp.transpose(x_sbd, (1, 0, 2))       # (B, S, D)
    h1 = ln(x, params["ln1_g"], params["ln1_b"])
    qkv = h1 @ params["w_in_t"] + params["b_in"]
    q, k, v = jnp.split(qkv, 3, axis=-1)
    B, S, _ = q.shape
    qh = q.reshape(B, S, N_HEAD, D_HEAD).transpose(0, 2, 1, 3)
    kh = k.reshape(B, S, N_HEAD, D_HEAD).transpose(0, 2, 1, 3)
    vh = v.reshape(B, S, N_HEAD, D_HEAD).transpose(0, 2, 1, 3)
    s = jnp.einsum("bhqd,bhkd->bhqk", qh, kh) / math.sqrt(D_HEAD)
    p = jax.nn.softmax(s, axis=-1)
    o = jnp.einsum("bhqk,bhkd->bhqd", p, vh).transpose(0, 2, 1, 3).reshape(B, S, D_MODEL)
    attn = o @ params["w_out_t"] + params["b_out"]
    x = x + attn
    h2 = ln(x, params["ln2_g"], params["ln2_b"])
    f = h2 @ params["w_fc_t"] + params["b_fc"]
    f = f * jax.nn.sigmoid(1.702 * f)
    f = f @ params["w_proj_t"] + params["b_proj"]
    x = x + f
    return jnp.transpose(x, (1, 0, 2))


def make_params(key):
    ks = jax.random.split(key, 8)
    p = {}
    # LayerNorms
    p["ln1_g"] = jnp.ones((1, D_MODEL), jnp.float32)
    p["ln1_b"] = jnp.zeros((1, D_MODEL), jnp.float32)
    p["ln2_g"] = jnp.ones((1, D_MODEL), jnp.float32)
    p["ln2_b"] = jnp.zeros((1, D_MODEL), jnp.float32)
    # MultiheadAttention in/out projections (stored pre-transposed: x @ W_t)
    p["w_in_t"] = (jax.random.normal(ks[0], (D_MODEL, 3 * D_MODEL), jnp.float32) * 0.05)
    p["b_in"] = (jax.random.normal(ks[1], (1, 3 * D_MODEL), jnp.float32) * 0.02)
    p["w_out_t"] = (jax.random.normal(ks[2], (D_MODEL, D_MODEL), jnp.float32) * 0.05)
    p["b_out"] = (jax.random.normal(ks[3], (1, D_MODEL), jnp.float32) * 0.02)
    # MLP
    p["w_fc_t"] = (jax.random.normal(ks[4], (D_MODEL, D_FF), jnp.float32) * 0.05)
    p["b_fc"] = (jax.random.normal(ks[5], (1, D_FF), jnp.float32) * 0.02)
    p["w_proj_t"] = (jax.random.normal(ks[6], (D_FF, D_MODEL), jnp.float32) * 0.05)
    p["b_proj"] = (jax.random.normal(ks[7], (1, D_MODEL), jnp.float32) * 0.02)
    return p


if __name__ == "__main__":
    key = jax.random.PRNGKey(0)
    k_x, k_p = jax.random.split(key)
    x = jax.random.normal(k_x, (SEQ, BATCH, D_MODEL), jnp.float32)
    params = make_params(k_p)

    prepared = prepare_params(params)   # one-time packing, outside jit

    out = residual_attention_block(x, prepared["slab32"], prepared["slab_fc"],
                                   prepared["attn_mask"])
    out = jax.block_until_ready(out)

    ref = reference(x, params)
    assert out.shape == (SEQ, BATCH, D_MODEL)
    assert jnp.allclose(out, ref, atol=2e-3, rtol=2e-3), "mismatch vs reference"

    print("KERNEL_OK")
</pallas_src>

<mosaic_0001>
module attributes {stable_mosaic.version = 11 : i64} {
  func.func @rab_kernel(%arg0: memref<16x32xf32, #tpu.memory_space<vmem>>, %arg1: memref<64x16xf32, #tpu.memory_space<vmem>>, %arg2: memref<392x32xf32, #tpu.memory_space<vmem>>, %arg3: memref<40x128xf32, #tpu.memory_space<vmem>>, %arg4: memref<16x32xf32, #tpu.memory_space<vmem>>) attributes {dimension_semantics = [], scalar_prefetch = 0 : i64, scratch_operands = 0 : i64, tpu.core_type = #tpu.core_type<tc>} {
    %c0 = arith.constant 0 : index
    %c0_0 = arith.constant 0 : index
    %0 = vector.load %arg0[%c0, %c0_0] : memref<16x32xf32, #tpu.memory_space<vmem>>, vector<16x32xf32>
    %c320 = arith.constant 320 : index
    %c0_1 = arith.constant 0 : index
    %1 = vector.load %arg2[%c320, %c0_1] : memref<392x32xf32, #tpu.memory_space<vmem>>, vector<1x32xf32>
    %c328 = arith.constant 328 : index
    %c0_2 = arith.constant 0 : index
    %2 = vector.load %arg2[%c328, %c0_2] : memref<392x32xf32, #tpu.memory_space<vmem>>, vector<1x32xf32>
    %cst = arith.constant dense<0.000000e+00> : vector<16xf32>
    %3 = vector.multi_reduction <add>, %0, %cst [1] : vector<16x32xf32> to vector<16xf32>
    %4 = vector.shape_cast %3 : vector<16xf32> to vector<16x1xf32>
    %cst_3 = arith.constant 3.200000e+01 : f32
    %5 = vector.broadcast %cst_3 : f32 to vector<16x1xf32>
    %6 = arith.divf %4, %5 : vector<16x1xf32>
    %7 = vector.broadcast %6 : vector<16x1xf32> to vector<16x32xf32>
    %8 = arith.subf %0, %7 : vector<16x32xf32>
    %9 = arith.mulf %8, %8 : vector<16x32xf32>
    %cst_4 = arith.constant dense<0.000000e+00> : vector<16xf32>
    %10 = vector.multi_reduction <add>, %9, %cst_4 [1] : vector<16x32xf32> to vector<16xf32>
    %11 = vector.shape_cast %10 : vector<16xf32> to vector<16x1xf32>
    %cst_5 = arith.constant 3.200000e+01 : f32
    %12 = vector.broadcast %cst_5 : f32 to vector<16x1xf32>
    %13 = arith.divf %11, %12 : vector<16x1xf32>
    %cst_6 = arith.constant 9.99999974E-6 : f32
    %14 = vector.broadcast %cst_6 : f32 to vector<16x1xf32>
    %15 = arith.addf %13, %14 : vector<16x1xf32>
    %16 = math.rsqrt %15 : vector<16x1xf32>
    %17 = vector.broadcast %16 : vector<16x1xf32> to vector<16x32xf32>
    %18 = arith.mulf %8, %17 : vector<16x32xf32>
    %19 = vector.broadcast %1 : vector<1x32xf32> to vector<16x32xf32>
    %20 = arith.mulf %18, %19 : vector<16x32xf32>
    %21 = vector.broadcast %2 : vector<1x32xf32> to vector<16x32xf32>
    %22 = arith.addf %20, %21 : vector<16x32xf32>
    %c0_7 = arith.constant 0 : index
    %c0_8 = arith.constant 0 : index
    %23 = vector.load %arg2[%c0_7, %c0_8] : memref<392x32xf32, #tpu.memory_space<vmem>>, vector<32x32xf32>
    %cst_9 = arith.constant dense<0.000000e+00> : vector<16x32xf32>
    %24 = tpu.matmul %22, %23, %cst_9 {dimension_numbers = #tpu.dot_dimension_numbers<[1], [0], [0], [1], [0, 0, 1, 1], [], []>} : vector<16x32xf32>, vector<32x32xf32>, vector<16x32xf32> -> vector<16x32xf32>
    %c352 = arith.constant 352 : index
    %c0_10 = arith.constant 0 : index
    %25 = vector.load %arg2[%c352, %c0_10] : memref<392x32xf32, #tpu.memory_space<vmem>>, vector<1x32xf32>
    %26 = vector.broadcast %25 : vector<1x32xf32> to vector<16x32xf32>
    %27 = arith.addf %24, %26 : vector<16x32xf32>
    %c32 = arith.constant 32 : index
    %c0_11 = arith.constant 0 : index
    %28 = vector.load %arg2[%c32, %c0_11] : memref<392x32xf32, #tpu.memory_space<vmem>>, vector<32x32xf32>
    %cst_12 = arith.constant dense<0.000000e+00> : vector<16x32xf32>
    %29 = tpu.matmul %22, %28, %cst_12 {dimension_numbers = #tpu.dot_dimension_numbers<[1], [0], [0], [1], [0, 0, 1, 1], [], []>} : vector<16x32xf32>, vector<32x32xf32>, vector<16x32xf32> -> vector<16x32xf32>
    %c360 = arith.constant 360 : index
    %c0_13 = arith.constant 0 : index
    %30 = vector.load %arg2[%c360, %c0_13] : memref<392x32xf32, #tpu.memory_space<vmem>>, vector<1x32xf32>
    %31 = vector.broadcast %30 : vector<1x32xf32> to vector<16x32xf32>
    %32 = arith.addf %29, %31 : vector<16x32xf32>
    %c64 = arith.constant 64 : index
    %c0_14 = arith.constant 0 : index
    %33 = vector.load %arg2[%c64, %c0_14] : memref<392x32xf32, #tpu.memory_space<vmem>>, vector<32x32xf32>
    %cst_15 = arith.constant dense<0.000000e+00> : vector<16x32xf32>
    %34 = tpu.matmul %22, %33, %cst_15 {dimension_numbers = #tpu.dot_dimension_numbers<[1], [0], [0], [1], [0, 0, 1, 1], [], []>} : vector<16x32xf32>, vector<32x32xf32>, vector<16x32xf32> -> vector<16x32xf32>
    %c368 = arith.constant 368 : index
    %c0_16 = arith.constant 0 : index
    %35 = vector.load %arg2[%c368, %c0_16] : memref<392x32xf32, #tpu.memory_space<vmem>>, vector<1x32xf32>
    %36 = vector.broadcast %35 : vector<1x32xf32> to vector<16x32xf32>
    %37 = arith.addf %34, %36 : vector<16x32xf32>
    %c256 = arith.constant 256 : index
    %c0_17 = arith.constant 0 : index
    %38 = vector.load %arg2[%c256, %c0_17] : memref<392x32xf32, #tpu.memory_space<vmem>>, vector<64x32xf32>
    %39 = tpu.concatenate %27, %27, %27, %27 in 0 : vector<16x32xf32>, vector<16x32xf32>, vector<16x32xf32>, vector<16x32xf32> -> vector<64x32xf32>
    %40 = arith.mulf %39, %38 : vector<64x32xf32>
    %41 = tpu.transpose %32, [1, 0] : vector<16x32xf32> -> vector<32x16xf32>
    %cst_18 = arith.constant dense<0.000000e+00> : vector<64x16xf32>
    %42 = tpu.matmul %40, %41, %cst_18 {dimension_numbers = #tpu.dot_dimension_numbers<[1], [0], [0], [1], [0, 0, 1, 1], [], []>} : vector<64x32xf32>, vector<32x16xf32>, vector<64x16xf32> -> vector<64x16xf32>
    %c0_19 = arith.constant 0 : index
    %c0_20 = arith.constant 0 : index
    %43 = vector.load %arg1[%c0_19, %c0_20] : memref<64x16xf32, #tpu.memory_space<vmem>>, vector<64x16xf32>
    %44 = arith.addf %42, %43 : vector<64x16xf32>
    %cst_21 = arith.constant dense<0xFF800000> : vector<64xf32>
    %45 = vector.multi_reduction <maximumf>, %44, %cst_21 [1] : vector<64x16xf32> to vector<64xf32>
    %46 = vector.shape_cast %45 : vector<64xf32> to vector<64x1xf32>
    %47 = vector.broadcast %46 : vector<64x1xf32> to vector<64x16xf32>
    %48 = arith.subf %44, %47 : vector<64x16xf32>
    %49 = math.exp %48 : vector<64x16xf32>
    %cst_22 = arith.constant dense<0.000000e+00> : vector<64xf32>
    %50 = vector.multi_reduction <add>, %49, %cst_22 [1] : vector<64x16xf32> to vector<64xf32>
    %51 = vector.shape_cast %50 : vector<64xf32> to vector<64x1xf32>
    %52 = tpu.reciprocal %51 {approx = true} : vector<64x1xf32> -> vector<64x1xf32>
    %53 = vector.broadcast %52 : vector<64x1xf32> to vector<64x16xf32>
    %54 = arith.mulf %49, %53 : vector<64x16xf32>
    %cst_23 = arith.constant dense<0.000000e+00> : vector<64x32xf32>
    %55 = tpu.matmul %54, %37, %cst_23 {dimension_numbers = #tpu.dot_dimension_numbers<[1], [0], [0], [1], [0, 0, 1, 1], [], []>} : vector<64x16xf32>, vector<16x32xf32>, vector<64x32xf32> -> vector<64x32xf32>
    %56 = arith.mulf %55, %38 : vector<64x32xf32>
    %57 = vector.extract_strided_slice %56 {offsets = [0, 0], sizes = [16, 32], strides = [1, 1]} : vector<64x32xf32> to vector<16x32xf32>
    %58 = vector.extract_strided_slice %56 {offsets = [16, 0], sizes = [16, 32], strides = [1, 1]} : vector<64x32xf32> to vector<16x32xf32>
    %59 = arith.addf %57, %58 : vector<16x32xf32>
    %60 = vector.extract_strided_slice %56 {offsets = [32, 0], sizes = [16, 32], strides = [1, 1]} : vector<64x32xf32> to vector<16x32xf32>
    %61 = arith.addf %59, %60 : vector<16x32xf32>
    %62 = vector.extract_strided_slice %56 {offsets = [48, 0], sizes = [16, 32], strides = [1, 1]} : vector<64x32xf32> to vector<16x32xf32>
    %63 = arith.addf %61, %62 : vector<16x32xf32>
    %c96 = arith.constant 96 : index
    %c0_24 = arith.constant 0 : index
    %64 = vector.load %arg2[%c96, %c0_24] : memref<392x32xf32, #tpu.memory_space<vmem>>, vector<32x32xf32>
    %cst_25 = arith.constant dense<0.000000e+00> : vector<16x32xf32>
    %65 = tpu.matmul %63, %64, %cst_25 {dimension_numbers = #tpu.dot_dimension_numbers<[1], [0], [0], [1], [0, 0, 1, 1], [], []>} : vector<16x32xf32>, vector<32x32xf32>, vector<16x32xf32> -> vector<16x32xf32>
    %c376 = arith.constant 376 : index
    %c0_26 = arith.constant 0 : index
    %66 = vector.load %arg2[%c376, %c0_26] : memref<392x32xf32, #tpu.memory_space<vmem>>, vector<1x32xf32>
    %67 = vector.broadcast %66 : vector<1x32xf32> to vector<16x32xf32>
    %68 = arith.addf %65, %67 : vector<16x32xf32>
    %69 = arith.addf %0, %68 : vector<16x32xf32>
    %c336 = arith.constant 336 : index
    %c0_27 = arith.constant 0 : index
    %70 = vector.load %arg2[%c336, %c0_27] : memref<392x32xf32, #tpu.memory_space<vmem>>, vector<1x32xf32>
    %c344 = arith.constant 344 : index
    %c0_28 = arith.constant 0 : index
    %71 = vector.load %arg2[%c344, %c0_28] : memref<392x32xf32, #tpu.memory_space<vmem>>, vector<1x32xf32>
    %cst_29 = arith.constant dense<0.000000e+00> : vector<16xf32>
    %72 = vector.multi_reduction <add>, %69, %cst_29 [1] : vector<16x32xf32> to vector<16xf32>
    %73 = vector.shape_cast %72 : vector<16xf32> to vector<16x1xf32>
    %cst_30 = arith.constant 3.200000e+01 : f32
    %74 = vector.broadcast %cst_30 : f32 to vector<16x1xf32>
    %75 = arith.divf %73, %74 : vector<16x1xf32>
    %76 = vector.broadcast %75 : vector<16x1xf32> to vector<16x32xf32>
    %77 = arith.subf %69, %76 : vector<16x32xf32>
    %78 = arith.mulf %77, %77 : vector<16x32xf32>
    %cst_31 = arith.constant dense<0.000000e+00> : vector<16xf32>
    %79 = vector.multi_reduction <add>, %78, %cst_31 [1] : vector<16x32xf32> to vector<16xf32>
    %80 = vector.shape_cast %79 : vector<16xf32> to vector<16x1xf32>
    %cst_32 = arith.constant 3.200000e+01 : f32
    %81 = vector.broadcast %cst_32 : f32 to vector<16x1xf32>
    %82 = arith.divf %80, %81 : vector<16x1xf32>
    %cst_33 = arith.constant 9.99999974E-6 : f32
    %83 = vector.broadcast %cst_33 : f32 to vector<16x1xf32>
    %84 = arith.addf %82, %83 : vector<16x1xf32>
    %85 = math.rsqrt %84 : vector<16x1xf32>
    %86 = vector.broadcast %85 : vector<16x1xf32> to vector<16x32xf32>
    %87 = arith.mulf %77, %86 : vector<16x32xf32>
    %88 = vector.broadcast %70 : vector<1x32xf32> to vector<16x32xf32>
    %89 = arith.mulf %87, %88 : vector<16x32xf32>
    %90 = vector.broadcast %71 : vector<1x32xf32> to vector<16x32xf32>
    %91 = arith.addf %89, %90 : vector<16x32xf32>
    %c0_34 = arith.constant 0 : index
    %c0_35 = arith.constant 0 : index
    %92 = vector.load %arg3[%c0_34, %c0_35] : memref<40x128xf32, #tpu.memory_space<vmem>>, vector<32x128xf32>
    %cst_36 = arith.constant dense<0.000000e+00> : vector<16x128xf32>
    %93 = tpu.matmul %91, %92, %cst_36 {dimension_numbers = #tpu.dot_dimension_numbers<[1], [0], [0], [1], [0, 0, 1, 1], [], []>} : vector<16x32xf32>, vector<32x128xf32>, vector<16x128xf32> -> vector<16x128xf32>
    %c32_37 = arith.constant 32 : index
    %c0_38 = arith.constant 0 : index
    %94 = vector.load %arg3[%c32_37, %c0_38] : memref<40x128xf32, #tpu.memory_space<vmem>>, vector<1x128xf32>
    %95 = vector.broadcast %94 : vector<1x128xf32> to vector<16x128xf32>
    %96 = arith.addf %93, %95 : vector<16x128xf32>
    %cst_39 = arith.constant 1.702000e+00 : f32
    %97 = vector.broadcast %cst_39 : f32 to vector<16x128xf32>
    %98 = arith.mulf %97, %96 : vector<16x128xf32>
    %99 = arith.negf %98 : vector<16x128xf32>
    %100 = math.exp %99 : vector<16x128xf32>
    %cst_40 = arith.constant 1.000000e+00 : f32
    %101 = vector.broadcast %cst_40 : f32 to vector<16x128xf32>
    %102 = arith.addf %101, %100 : vector<16x128xf32>
    %103 = arith.divf %101, %102 : vector<16x128xf32>
    %104 = arith.mulf %96, %103 : vector<16x128xf32>
    %c128 = arith.constant 128 : index
    %c0_41 = arith.constant 0 : index
    %105 = vector.load %arg2[%c128, %c0_41] : memref<392x32xf32, #tpu.memory_space<vmem>>, vector<128x32xf32>
    %cst_42 = arith.constant dense<0.000000e+00> : vector<16x32xf32>
    %106 = tpu.matmul %104, %105, %cst_42 {dimension_numbers = #tpu.dot_dimension_numbers<[1], [0], [0], [1], [0, 0, 1, 1], [], []>} : vector<16x128xf32>, vector<128x32xf32>, vector<16x32xf32> -> vector<16x32xf32>
    %c384 = arith.constant 384 : index
    %c0_43 = arith.constant 0 : index
    %107 = vector.load %arg2[%c384, %c0_43] : memref<392x32xf32, #tpu.memory_space<vmem>>, vector<1x32xf32>
    %108 = vector.broadcast %107 : vector<1x32xf32> to vector<16x32xf32>
    %109 = arith.addf %106, %108 : vector<16x32xf32>
    %110 = arith.addf %69, %109 : vector<16x32xf32>
    %c0_44 = arith.constant 0 : index
    %c0_45 = arith.constant 0 : index
    %111 = vector.load %arg4[%c0_44, %c0_45] : memref<16x32xf32, #tpu.memory_space<vmem>>, vector<16x32xf32>
    tpu.vector_store %arg4[%c0_44, %c0_45], %110 {strides = array<i32>} : memref<16x32xf32, #tpu.memory_space<vmem>>, vector<16x32xf32>,
    return
  }
}

</mosaic_0001>

<bundles_post_ra>
// kernel: residual_attention_block.1
= control target key start
LH: loop header
LB: loop body
LE: loop exit
PB: predicated region body
PF: predicated region fallthrough
CT: control target
= control target key end

     0   :  { %vm22_vm0 = vcmask 261120   ;;  %s1129_s0 = inlined_call_operand.vmem [shape: f32[16,32], index: 0, kind: input, shape index: {}]   ;;  %s1130_s1 = inlined_call_operand.vmem [shape: f32[64,16], index: 1, kind: input, shape index: {}]   ;;  %s1131_s2 = inlined_call_operand.vmem [shape: f32[392,32], index: 2, kind: input, shape index: {}]   ;;  %s1132_s3 = inlined_call_operand.vmem [shape: f32[40,128], index: 3, kind: input, shape index: {}]   ;;  %s1133_s4 = inlined_call_operand.hbm [shape: f32[16,32], index: 4, kind: output, shape index: {}]  }
   0x1   :  { %v821_v0 = vld [vmem:[%s1129_s0] sm:$0xff]  ;;  %v828_v2 = vld [vmem:[%s1129_s0 + $0x8] sm:$0xff] }
   0x2   :  { %v23_v1 = vsel %vm22_vm0, %v821_v0, 0.0 }
   0x3   :  { %24 = vadd.xlane.f32.xlu0 %v23_v1 }
   0x4   :  { %9 = vsyncpa [#allocation3], 0  ;;  %v26_v3 = vsel %vm22_vm0, %v828_v2, 0.0  ;;  %v789_v4 = vmov 32.0   ;;  %v83_v21 = vld [vmem:[%s1131_s2 + $0x18] sm:$0xff]  ;;  %v82_v23 = vld [vmem:[%s1131_s2 + $0x10] sm:$0xff] }
   0x5   :  { %713 = vrcp.f32 %v789_v4  ;;  %v118_v22 = vld [vmem:[%s1131_s2 + $0x38] sm:$0xff]  ;;  %104 = vmatpush.msra.mxu2 %v83_v21  ;;  %v117_v24 = vld [vmem:[%s1131_s2 + $0x30] sm:$0xff]  ;;  %v81_v25 = vld [vmem:[%s1131_s2 + $0x8] sm:$0xff]  ;;  %vm268_vm8 = vcmask 130048   ;;  %s790_s30 = smov [#allocation2]   ;;  %s653_s8 = sshll.u32 %s1133_s4, 4  ;;  %s654_s8 = int_to_ptr.hbm [resolvable:$true] %s653_s8 }
   0x6   :  { %133 = vmatpush.msra.mxu1 %v118_v22  ;;  %v116_v26 = vld [vmem:[%s1131_s2 + $0x28] sm:$0xff]  ;;  %v80_v27 = vld [vmem:[%s1131_s2] sm:$0xff]  ;;  %v147_v52 = vld [vmem:[%s1131_s2 + $0x58] sm:$0xff]  ;;  %s651_s5 = sshll.u32 %s790_s30, 4  ;;  %s792_s9 = smov 8   ;;  %s652_s5 = int_to_ptr.vmem [resolvable:$true] %s651_s5 }
   0x7   :  { %105 = vmatpush.msra.mxu2 %v82_v23  ;;  %v115_v28 = vld [vmem:[%s1131_s2 + $0x20] sm:$0xff]  ;;  %v704_v47 = vld [vmem:[%s1131_s2 + $0x148] ss:$0 sm:$0xff]  ;;  %v146_v54 = vld [vmem:[%s1131_s2 + $0x50] sm:$0xff] }
   0x8   :  { %134 = vmatpush.msra.mxu1 %v117_v24  ;;  %v703_v43 = vld [vmem:[%s1131_s2 + $0x140] ss:$0 sm:$0xff]  ;;  %v145_v57 = vld [vmem:[%s1131_s2 + $0x48] sm:$0xff]  ;;  %v925_v21 = vld [vmem:[%s1131_s2 + $0x118] sm:$0xff] }
   0x9   :  { %106 = vmatpush.msra.mxu2 %v81_v25  ;;  %v144_v59 = vld [vmem:[%s1131_s2 + $0x40] sm:$0xff]  ;;  %v705_v63 = vld [vmem:[%s1131_s2 + $0x168] ss:$0 sm:$0xff] }
   0xa   :  { %135 = vmatpush.msra.mxu1 %v116_v26  ;;  %v706_v1 = vld [vmem:[%s1131_s2 + $0x160] ss:$0 sm:$0xff]  ;;  %v939_v25 = vld [vmem:[%s1131_s2 + $0x128] sm:$0xff] }
   0xb   :  { %27 = vadd.xlane.f32.xlu0 %v26_v3  ;;  %v714_v5 = vpop.eup %713  ;;  %107 = vmatpush.msra.mxu2 %v80_v27  ;;  %v932_v23 = vld [vmem:[%s1131_s2 + $0x120] sm:$0xff]  ;;  %v946_v27 = vld [vmem:[%s1131_s2 + $0x130] sm:$0xff] }
   0xc   :  { %v30_v6 = vmul.f32 32.0, %v714_v5  ;;  %vm34_vm1 = vweird.f32 %v714_v5  ;;  %136 = vmatpush.msra.mxu1 %v115_v28 }
   0xd   :  { %695 = vmatpush.msrb.mxu2 %v118_v22 }
   0xe   :  { %v31_v7 = vsub.f32 1.0, %v30_v6 }
   0xf   :  { %696 = vmatpush.msrb.mxu2 %v117_v24 }
  0x10   :  { %v32_v8 = vmul.f32 %v714_v5, %v31_v7 }
  0x11   :  { %697 = vmatpush.msrb.mxu2 %v116_v26 }
  0x12   :  { %v33_v9 = vadd.f32 %v714_v5, %v32_v8  ;;  %v900_v8 = vld [vmem:[%s1131_s2 + $0x100] sm:$0xff] }
  0x13   :  { %698 = vmatpush.msrb.mxu2 %v115_v28 }
  0x14   :  { %v832_v10 = vsel %vm34_vm1, %v714_v5, %v33_v9 }
  0x76   :  { %v25_v11 = vpop.xlane.xlu0 %24 }
  0x77   :  { %v36_v12 = vmul.f32 %v832_v10, %v25_v11 }
  0x79   :  { %v38_v13 = vsub.f32 %v821_v0, %v36_v12 }
  0x7b   :  { %v40_v14 = vmul.f32 %v38_v13, %v38_v13 }
  0x7d   :  { %v42_v15 = vsel %vm22_vm0, %v40_v14, 0.0  ;;  %v707_v14 = vld [vmem:[%s1131_s2 + $0x170] ss:$0 sm:$0xff] }
  0x7e   :  { %43 = vadd.xlane.f32.xlu1 %v42_v15  ;;  %v28_v16 = vpop.xlane.xlu0 %27 }
  0x7f   :  { %v37_v17 = vmul.f32 %v832_v10, %v28_v16 }
  0x81   :  { %v39_v18 = vsub.f32 %v828_v2, %v37_v17 }
  0x83   :  { %v41_v19 = vmul.f32 %v39_v18, %v39_v18 }
  0x85   :  { %v45_v20 = vsel %vm22_vm0, %v41_v19, 0.0  ;;  %v918_v19 = vld [vmem:[%s1131_s2 + $0x110] sm:$0xff] }
  0x86   :  { %46 = vadd.xlane.f32.xlu1 %v45_v20 }
  0xf1   :  { %v44_v29 = vpop.xlane.xlu1 %43 }
  0xf2   :  { %v48_v30 = vmul.f32 %v44_v29, %v832_v10  ;;  %v953_v29 = vld [vmem:[%s1131_s2 + $0x138] sm:$0xff] }
  0xf4   :  { %v50_v31 = vadd.f32 1e-05, %v48_v30 }
  0xf6   :  { %715 = vrsqrt.f32 %v50_v31  ;;  %vm58_vm3 = vweird.f32 %v50_v31 }
  0xf9   :  { %v47_v32 = vpop.xlane.xlu1 %46 }
  0xfa   :  { %v49_v33 = vmul.f32 %v47_v32, %v832_v10 }
  0xfc   :  { %v716_v34 = vpop.eup %715  ;;  %v51_v35 = vadd.f32 1e-05, %v49_v33 }
  0xfd   :  { %v53_v36 = vmul.f32 %v716_v34, %v50_v31  ;;  %vm59_vm2 = vweird.f32 %v716_v34  ;;  %v189_v31 = vld [vmem:[%s1130_s1] sm:$0xff] }
  0xfe   :  { %717 = vrsqrt.f32 %v51_v35  ;;  %vm60_vm4 = vmor %vm58_vm3, %vm59_vm2  ;;  %vm68_vm6 = vweird.f32 %v51_v35 }
  0xff   :  { %v54_v37 = vmul.f32 %v716_v34, %v53_v36 }
 0x101   :  { %v55_v38 = vmul.f32 0.5, %v54_v37 }
 0x103   :  { %v56_v39 = vsub.f32 1.5, %v55_v38 }
 0x104   :  { %v718_v40 = vpop.eup %717 }
 0x105   :  { %v57_v41 = vmul.f32 %v716_v34, %v56_v39  ;;  %v63_v42 = vmul.f32 %v718_v40, %v51_v35  ;;  %vm69_vm5 = vweird.f32 %v718_v40  ;;  %v190_v35 = vld [vmem:[%s1130_s1 + $0x8] sm:$0xff]  ;;  %v191_v39 = vld [vmem:[%s1130_s1 + $0x10] sm:$0xff] }
 0x106   :  { %vm70_vm7 = vmor %vm68_vm6, %vm69_vm5 }
 0x107   :  { %v61_v44 = vsel %vm60_vm4, %v716_v34, %v57_v41  ;;  %v64_v45 = vmul.f32 %v718_v40, %v63_v42 }
 0x108   :  { %v72_v46 = vmul.f32 %v61_v44, %v38_v13  ;;  %v908_v13 = vld [vmem:[%s1131_s2 + $0x108] sm:$0xff] }
 0x109   :  { %v65_v48 = vmul.f32 0.5, %v64_v45 }
 0x10a   :  { %v75_v49 = vmul.f32 %v703_v43, %v72_v46 }
 0x10b   :  { %v66_v50 = vsub.f32 1.5, %v65_v48 }
 0x10c   :  { %v78_v51 = vadd.f32 %v704_v47, %v75_v49 }
 0x10d   :  { %v67_v53 = vmul.f32 %v718_v40, %v66_v50 }
 0x10e   :  { %665 = vmatmul.msk.f32.vlgmr.msra.gmra.mxu2 %vm22_vm0, %v78_v51  ;;  %667 = vmatmul.msk.f32.vlgmr.msra.gmra.mxu1 %vm22_vm0, %v78_v51 }
 0x10f   :  { %v71_v55 = vsel %vm70_vm7, %v718_v40, %v67_v53  ;;  %162 = vmatpush.msra.mxu2 %v147_v52 }
 0x110   :  { %v73_v56 = vmul.f32 %v71_v55, %v39_v18  ;;  %v195_v55 = vld [vmem:[%s1130_s1 + $0x30] sm:$0xff] }
 0x111   :  { %163 = vmatpush.msra.mxu2 %v146_v54 }
 0x112   :  { %v76_v58 = vmul.f32 %v703_v43, %v73_v56  ;;  %v192_v43 = vld [vmem:[%s1130_s1 + $0x18] sm:$0xff] }
 0x113   :  { %164 = vmatpush.msra.mxu2 %v145_v57 }
 0x114   :  { %v79_v60 = vadd.f32 %v704_v47, %v76_v58  ;;  %v193_v47 = vld [vmem:[%s1130_s1 + $0x20] sm:$0xff] }
 0x115   :  { %165 = vmatpush.msra.mxu2 %v144_v59  ;;  %v196_v59 = vld [vmem:[%s1130_s1 + $0x38] sm:$0xff] }
 0x116   :  { %666 = vmatmul.msk.f32.gmra.mxu2 %vm22_vm0, %v79_v60 }
 0x11e   :  { %668 = vmatmul.msk.f32.vlgmr.msrb.gmra.mxu2 %vm22_vm0, %v79_v60 }
 0x126   :  { %669 = vmatmul.msk.f32.vlgmr.msra.gmra.mxu2 %vm22_vm0, %v78_v51  ;;  %v194_v51 = vld [vmem:[%s1130_s1 + $0x28] sm:$0xff] }
 0x12e   :  { %670 = vmatmul.msk.f32.gmra.mxu2 %vm22_vm0, %v79_v60 }
 0x18b   :  { %v138_v5 = vpop.f32.mrf.mxu1 }
 0x18c   :  { %v139_v7 = vadd.f32 %v705_v63, %v138_v5 }
 0x191   :  { %v109_v61 = vpop.f32.mrf.mxu2 }
 0x192   :  { %v110_v6 = vadd.f32 %v706_v1, %v109_v61 }
 0x194   :  { %v181_v11 = vmul.f32 %v900_v8, %v110_v6  ;;  %v183_v20 = vmul.f32 %v918_v19, %v110_v6  ;;  %v185_v24 = vmul.f32 %v932_v23, %v110_v6  ;;  %v187_v28 = vmul.f32 %v946_v27, %v110_v6 }
 0x199   :  { %v112_v62 = vpop.f32.mrf.mxu2 }
 0x19a   :  { %v113_v12 = vadd.f32 %v706_v1, %v112_v62 }
 0x19c   :  { %v182_v16 = vmul.f32 %v908_v13, %v113_v12  ;;  %v184_v22 = vmul.f32 %v925_v21, %v113_v12  ;;  %v186_v26 = vmul.f32 %v939_v25, %v113_v12  ;;  %v188_v30 = vmul.f32 %v953_v29, %v113_v12 }
 0x1a1   :  { %v141_v3 = vpop.f32.mrf.mxu2 }
 0x1a2   :  { %v142_v4 = vadd.f32 %v705_v63, %v141_v3 }
 0x1a4   :  { %671 = vmatpush.xpose.msk.msra.mxu3 %vm22_vm0, %v142_v4 }
 0x1a8   :  { %672 = vmatpush.xpose.msk.msra.mxu3 %vm22_vm0, %v139_v7 }
 0x1a9   :  { %v167_v9 = vpop.f32.mrf.mxu2 }
 0x1aa   :  { %v168_v18 = vadd.f32 %v707_v14, %v167_v9 }
 0x1ab   :  { %673 = vmatmul.msk.f32.vlgmr.msra.gmra.mxu3 %vm22_vm0, %v181_v11 }
 0x1b1   :  { %v170_v15 = vpop.f32.mrf.mxu2 }
 0x1b2   :  { %v171_v17 = vadd.f32 %v707_v14, %v170_v15 }
 0x1b3   :  { %674 = vmatmul.msk.f32.gmra.mxu3 %vm22_vm0, %v182_v16 }
 0x1b4   :  { %395 = vmatpush.msra.mxu0 %v171_v17 }
 0x1b6   :  { %396 = vmatpush.msra.mxu0 %v168_v18 }
 0x1bb   :  { %675 = vmatmul.msk.f32.gmra.mxu3 %vm22_vm0, %v183_v20 }
 0x1c3   :  { %676 = vmatmul.msk.f32.gmra.mxu3 %vm22_vm0, %v184_v22 }
 0x1cb   :  { %677 = vmatmul.msk.f32.gmra.mxu3 %vm22_vm0, %v185_v24 }
 0x1d3   :  { %678 = vmatmul.msk.f32.gmra.mxu3 %vm22_vm0, %v186_v26 }
 0x1db   :  { %679 = vmatmul.msk.f32.gmra.mxu3 %vm22_vm0, %v187_v28 }
 0x1e3   :  { %680 = vmatmul.msk.f32.gmra.mxu3 %vm22_vm0, %v188_v30 }
 0x22e   :  { %v244_v32 = vpop.f32.mrf.mxu3 }
 0x22f   :  { %v245_v33 = vadd.f32 %v244_v32, %v189_v31 }
 0x231   :  { %v269_v34 = vsel %vm268_vm8, %v245_v33, -inf }
 0x232   :  { %270 = vmax.xlane.f32.xlu2 %v269_v34 }
 0x236   :  { %v247_v36 = vpop.f32.mrf.mxu3 }
 0x237   :  { %v248_v37 = vadd.f32 %v247_v36, %v190_v35 }
 0x239   :  { %v272_v38 = vsel %vm268_vm8, %v248_v37, -inf }
 0x23a   :  { %273 = vmax.xlane.f32.xlu2 %v272_v38 }
 0x23e   :  { %v250_v40 = vpop.f32.mrf.mxu3 }
 0x23f   :  { %v251_v41 = vadd.f32 %v250_v40, %v191_v39 }
 0x241   :  { %v275_v42 = vsel %vm268_vm8, %v251_v41, -inf }
 0x242   :  { %276 = vmax.xlane.f32.xlu0 %v275_v42 }
 0x246   :  { %v253_v44 = vpop.f32.mrf.mxu3 }
 0x247   :  { %v254_v45 = vadd.f32 %v253_v44, %v192_v43 }
 0x249   :  { %v278_v46 = vsel %vm268_vm8, %v254_v45, -inf }
 0x24a   :  { %279 = vmax.xlane.f32.xlu1 %v278_v46 }
 0x24e   :  { %v256_v48 = vpop.f32.mrf.mxu3 }
 0x24f   :  { %v257_v49 = vadd.f32 %v256_v48, %v193_v47 }
 0x251   :  { %v281_v50 = vsel %vm268_vm8, %v257_v49, -inf }
 0x252   :  { %282 = vmax.xlane.f32.xlu2 %v281_v50 }
 0x256   :  { %v259_v52 = vpop.f32.mrf.mxu3 }
 0x257   :  { %v260_v53 = vadd.f32 %v259_v52, %v194_v51 }
 0x259   :  { %v284_v54 = vsel %vm268_vm8, %v260_v53, -inf }
 0x25a   :  { %285 = vmax.xlane.f32.xlu0 %v284_v54 }
 0x25e   :  { %v262_v56 = vpop.f32.mrf.mxu3 }
 0x25f   :  { %v263_v57 = vadd.f32 %v262_v56, %v195_v55 }
 0x261   :  { %v287_v58 = vsel %vm268_vm8, %v263_v57, -inf }
 0x262   :  { %288 = vmax.xlane.f32.xlu1 %v287_v58 }
 0x266   :  { %v265_v60 = vpop.f32.mrf.mxu3 }
 0x267   :  { %v266_v61 = vadd.f32 %v265_v60, %v196_v59 }
 0x269   :  { %v290_v62 = vsel %vm268_vm8, %v266_v61, -inf }
 0x26a   :  { %291 = vmax.xlane.f32.xlu0 %v290_v62 }
 0x2a5   :  { %v271_v63 = vpop.xlane.xlu2 %270 }
 0x2a6   :  { %v293_v1 = vsub.f32 %v245_v33, %v271_v63 }
 0x2a8   :  { %v301_v3 = vmul.f32 1.442695, %v293_v1 }
 0x2aa   :  { %719 = vpow2.f32 %v301_v3 }
 0x2ad   :  { %v274_v4 = vpop.xlane.xlu2 %273 }
 0x2ae   :  { %v294_v5 = vsub.f32 %v248_v37, %v274_v4 }
 0x2b0   :  { %v720_v6 = vpop.eup %719  ;;  %v303_v7 = vmul.f32 1.442695, %v294_v5 }
 0x2b1   :  { %v317_v9 = vsel %vm268_vm8, %v720_v6, 0.0 }
 0x2b2   :  { %721 = vpow2.f32 %v303_v7  ;;  %318 = vadd.xlane.f32.xlu2 %v317_v9 }
 0x2b5   :  { %v277_v11 = vpop.xlane.xlu0 %276 }
 0x2b6   :  { %v295_v12 = vsub.f32 %v251_v41, %v277_v11 }
 0x2b8   :  { %v722_v14 = vpop.eup %721  ;;  %v305_v15 = vmul.f32 1.442695, %v295_v12 }
 0x2b9   :  { %v320_v16 = vsel %vm268_vm8, %v722_v14, 0.0 }
 0x2ba   :  { %723 = vpow2.f32 %v305_v15  ;;  %321 = vadd.xlane.f32.xlu1 %v320_v16 }
 0x2bd   :  { %v280_v17 = vpop.xlane.xlu1 %279 }
 0x2be   :  { %v296_v18 = vsub.f32 %v254_v45, %v280_v17  ;;  %v439_v17 = vld [vmem:[%s1131_s2 + $0x78] sm:$0xff] }
 0x2bf   :  { %460 = vmatpush.msrb.mxu1 %v439_v17 }
 0x2c0   :  { %v724_v20 = vpop.eup %723  ;;  %v307_v22 = vmul.f32 1.442695, %v296_v18  ;;  %v438_v18 = vld [vmem:[%s1131_s2 + $0x70] sm:$0xff] }
 0x2c1   :  { %v323_v24 = vsel %vm268_vm8, %v724_v20, 0.0  ;;  %461 = vmatpush.msrb.mxu1 %v438_v18  ;;  %v710_v18 = vld [vmem:[%s1131_s2 + $0x158] ss:$0 sm:$0xff] }
 0x2c2   :  { %725 = vpow2.f32 %v307_v22  ;;  %324 = vadd.xlane.f32.xlu2 %v323_v24  ;;  %v437_v22 = vld [vmem:[%s1131_s2 + $0x68] sm:$0xff]  ;;  %v436_v24 = vld [vmem:[%s1131_s2 + $0x60] sm:$0xff] }
 0x2c3   :  { %462 = vmatpush.msrb.mxu1 %v437_v22 }
 0x2c5   :  { %v283_v26 = vpop.xlane.xlu2 %282  ;;  %463 = vmatpush.msrb.mxu1 %v436_v24 }
 0x2c6   :  { %v297_v28 = vsub.f32 %v257_v49, %v283_v26 }
 0x2c8   :  { %v726_v30 = vpop.eup %725  ;;  %v309_v31 = vmul.f32 1.442695, %v297_v28 }
 0x2c9   :  { %v326_v32 = vsel %vm268_vm8, %v726_v30, 0.0 }
 0x2ca   :  { %727 = vpow2.f32 %v309_v31  ;;  %327 = vadd.xlane.f32.xlu0 %v326_v32 }
 0x2cd   :  { %v286_v33 = vpop.xlane.xlu0 %285 }
 0x2ce   :  { %v298_v34 = vsub.f32 %v260_v53, %v286_v33 }
 0x2d0   :  { %v728_v35 = vpop.eup %727  ;;  %v311_v36 = vmul.f32 1.442695, %v298_v34 }
 0x2d1   :  { %v329_v37 = vsel %vm268_vm8, %v728_v35, 0.0 }
 0x2d2   :  { %729 = vpow2.f32 %v311_v36  ;;  %330 = vadd.xlane.f32.xlu1 %v329_v37 }
 0x2d5   :  { %v289_v38 = vpop.xlane.xlu1 %288 }
 0x2d6   :  { %v299_v39 = vsub.f32 %v263_v57, %v289_v38 }
 0x2d8   :  { %v730_v40 = vpop.eup %729  ;;  %v313_v41 = vmul.f32 1.442695, %v299_v39 }
 0x2d9   :  { %v332_v42 = vsel %vm268_vm8, %v730_v40, 0.0 }
 0x2da   :  { %731 = vpow2.f32 %v313_v41  ;;  %333 = vadd.xlane.f32.xlu2 %v332_v42 }
 0x2dd   :  { %v292_v43 = vpop.xlane.xlu0 %291 }
 0x2de   :  { %v300_v44 = vsub.f32 %v266_v61, %v292_v43 }
 0x2e0   :  { %v732_v45 = vpop.eup %731  ;;  %v315_v46 = vmul.f32 1.442695, %v300_v44 }
 0x2e1   :  { %v335_v47 = vsel %vm268_vm8, %v732_v45, 0.0 }
 0x2e2   :  { %733 = vpow2.f32 %v315_v46  ;;  %336 = vadd.xlane.f32.xlu0 %v335_v47 }
 0x2e8   :  { %v734_v48 = vpop.eup %733 }
 0x2e9   :  { %v338_v49 = vsel %vm268_vm8, %v734_v48, 0.0 }
 0x2ea   :  { %339 = vadd.xlane.f32.xlu1 %v338_v49 }
 0x325   :  { %v319_v50 = vpop.xlane.xlu2 %318 }
 0x326   :  { %735 = vrcp.f32 %v319_v50 }
 0x32c   :  { %v736_v51 = vpop.eup %735 }
 0x32d   :  { %v322_v52 = vpop.xlane.xlu1 %321  ;;  %v349_v53 = vmul.f32 %v736_v51, %v720_v6 }
 0x32e   :  { %737 = vrcp.f32 %v322_v52 }
 0x32f   :  { %681 = vmatmul.msk.f32.vlgmr.msra.gmra.mxu0 %vm268_vm8, %v349_v53 }
 0x334   :  { %v738_v54 = vpop.eup %737 }
 0x335   :  { %v325_v55 = vpop.xlane.xlu2 %324  ;;  %v350_v56 = vmul.f32 %v738_v54, %v722_v14 }
 0x336   :  { %739 = vrcp.f32 %v325_v55 }
 0x337   :  { %682 = vmatmul.msk.f32.gmra.mxu0 %vm268_vm8, %v350_v56  ;;  %v528_v56 = vld [vmem:[%s1132_s3 + $0x18] sm:$0xff] }
 0x338   :  { %549 = vmatpush.msrb.mxu2 %v528_v56 }
 0x33c   :  { %v740_v57 = vpop.eup %739 }
 0x33d   :  { %v328_v58 = vpop.xlane.xlu0 %327  ;;  %v351_v59 = vmul.f32 %v740_v57, %v724_v20  ;;  %v527_v57 = vld [vmem:[%s1132_s3 + $0x10] sm:$0xff] }
 0x33e   :  { %741 = vrcp.f32 %v328_v58  ;;  %550 = vmatpush.msrb.mxu2 %v527_v57  ;;  %v526_v58 = vld [vmem:[%s1132_s3 + $0x8] sm:$0xff] }
 0x33f   :  { %683 = vmatmul.msk.f32.gmra.mxu0 %vm268_vm8, %v351_v59  ;;  %v525_v59 = vld [vmem:[%s1132_s3] sm:$0xff] }
 0x340   :  { %551 = vmatpush.msrb.mxu2 %v526_v58 }
 0x342   :  { %552 = vmatpush.msrb.mxu2 %v525_v59 }
 0x344   :  { %v742_v60 = vpop.eup %741 }
 0x345   :  { %v331_v61 = vpop.xlane.xlu1 %330  ;;  %v352_v62 = vmul.f32 %v742_v60, %v726_v30 }
 0x346   :  { %743 = vrcp.f32 %v331_v61 }
 0x347   :  { %684 = vmatmul.msk.f32.gmra.mxu0 %vm268_vm8, %v352_v62 }
 0x34c   :  { %v744_v63 = vpop.eup %743 }
 0x34d   :  { %v334_v1 = vpop.xlane.xlu2 %333  ;;  %v353_v3 = vmul.f32 %v744_v63, %v728_v35 }
 0x34e   :  { %745 = vrcp.f32 %v334_v1 }
 0x34f   :  { %685 = vmatmul.msk.f32.gmra.mxu0 %vm268_vm8, %v353_v3 }
 0x354   :  { %v746_v4 = vpop.eup %745 }
 0x355   :  { %v337_v5 = vpop.xlane.xlu0 %336  ;;  %v354_v6 = vmul.f32 %v746_v4, %v730_v40 }
 0x356   :  { %747 = vrcp.f32 %v337_v5 }
 0x357   :  { %686 = vmatmul.msk.f32.gmra.mxu0 %vm268_vm8, %v354_v6 }
 0x35c   :  { %v748_v7 = vpop.eup %747 }
 0x35d   :  { %v340_v9 = vpop.xlane.xlu1 %339  ;;  %v355_v11 = vmul.f32 %v748_v7, %v732_v45 }
 0x35e   :  { %749 = vrcp.f32 %v340_v9 }
 0x35f   :  { %687 = vmatmul.msk.f32.gmra.mxu0 %vm268_vm8, %v355_v11 }
 0x364   :  { %v750_v12 = vpop.eup %749 }
 0x365   :  { %v356_v14 = vmul.f32 %v750_v12, %v734_v48 }
 0x367   :  { %688 = vmatmul.msk.f32.gmra.mxu0 %vm268_vm8, %v356_v14 }
 0x3ac   :  { %v398_v15 = vpop.f32.mrf.mxu0 }
 0x3ad   :  { %v422_v32 = vmul.f32 %v398_v15, %v900_v8  ;;  %v709_v15 = vld [vmem:[%s1131_s2 + $0x150] ss:$0 sm:$0xff] }
 0x3b4   :  { %v401_v16 = vpop.f32.mrf.mxu0 }
 0x3b5   :  { %v423_v40 = vmul.f32 %v401_v16, %v908_v13 }
 0x3bc   :  { %v404_v20 = vpop.f32.mrf.mxu0 }
 0x3bd   :  { %v424_v31 = vmul.f32 %v404_v20, %v918_v19 }
 0x3bf   :  { %v430_v34 = vadd.f32 %v424_v31, %v422_v32 }
 0x3c4   :  { %v407_v26 = vpop.f32.mrf.mxu0 }
 0x3c5   :  { %v425_v38 = vmul.f32 %v407_v26, %v925_v21 }
 0x3c7   :  { %v431_v42 = vadd.f32 %v425_v38, %v423_v40  ;;  %v613_v38 = vld [vmem:[%s1131_s2 + $0xd8] sm:$0xff]  ;;  %v611_v40 = vld [vmem:[%s1131_s2 + $0xc8] sm:$0xff] }
 0x3cc   :  { %v410_v28 = vpop.f32.mrf.mxu0 }
 0x3cd   :  { %v426_v33 = vmul.f32 %v410_v28, %v932_v23 }
 0x3cf   :  { %v432_v36 = vadd.f32 %v430_v34, %v426_v33  ;;  %v617_v34 = vld [vmem:[%s1131_s2 + $0xf8] sm:$0xff] }
 0x3d0   :  { %620 = vmatpush.msra.mxu1 %v617_v34 }
 0x3d4   :  { %v413_v30 = vpop.f32.mrf.mxu0 }
 0x3d5   :  { %v427_v41 = vmul.f32 %v413_v30, %v939_v25 }
 0x3d7   :  { %v433_v43 = vadd.f32 %v431_v42, %v427_v41  ;;  %v610_v41 = vld [vmem:[%s1131_s2 + $0xc0] sm:$0xff]  ;;  %v609_v42 = vld [vmem:[%s1131_s2 + $0xb8] sm:$0xff] }
 0x3dc   :  { %v416_v35 = vpop.f32.mrf.mxu0 }
 0x3dd   :  { %v428_v37 = vmul.f32 %v416_v35, %v946_v27  ;;  %v708_v27 = vld [vmem:[%s1131_s2 + $0x178] ss:$0 sm:$0xff]  ;;  %v616_v35 = vld [vmem:[%s1131_s2 + $0xf0] sm:$0xff] }
 0x3de   :  { %621 = vmatpush.msra.mxu1 %v616_v35 }
 0x3df   :  { %v434_v39 = vadd.f32 %v432_v36, %v428_v37  ;;  %v615_v36 = vld [vmem:[%s1131_s2 + $0xe8] sm:$0xff]  ;;  %v614_v37 = vld [vmem:[%s1131_s2 + $0xe0] sm:$0xff] }
 0x3e0   :  { %622 = vmatpush.msra.mxu1 %v615_v36 }
 0x3e1   :  { %689 = vmatmul.msk.f32.vlgmr.msrb.gmra.mxu1 %vm22_vm0, %v434_v39  ;;  %v612_v39 = vld [vmem:[%s1131_s2 + $0xd0] sm:$0xff] }
 0x3e2   :  { %623 = vmatpush.msra.mxu1 %v614_v37 }
 0x3e4   :  { %v419_v19 = vpop.f32.mrf.mxu0  ;;  %624 = vmatpush.msra.mxu1 %v613_v38 }
 0x3e5   :  { %v429_v8 = vmul.f32 %v419_v19, %v953_v29  ;;  %v608_v19 = vld [vmem:[%s1131_s2 + $0xb0] sm:$0xff] }
 0x3e6   :  { %625 = vmatpush.msra.mxu1 %v612_v39 }
 0x3e7   :  { %v435_v23 = vadd.f32 %v433_v43, %v429_v8  ;;  %v607_v43 = vld [vmem:[%s1131_s2 + $0xa8] sm:$0xff]  ;;  %v606_v8 = vld [vmem:[%s1131_s2 + $0xa0] sm:$0xff] }
 0x3e8   :  { %626 = vmatpush.msra.mxu1 %v611_v40 }
 0x3e9   :  { %690 = vmatmul.msk.f32.gmra.mxu1 %vm22_vm0, %v435_v23  ;;  %v605_v23 = vld [vmem:[%s1131_s2 + $0x98] sm:$0xff] }
 0x3ea   :  { %627 = vmatpush.msra.mxu1 %v610_v41 }
 0x3ec   :  { %628 = vmatpush.msra.mxu1 %v609_v42 }
 0x3ee   :  { %629 = vmatpush.msra.mxu1 %v608_v19 }
 0x3f0   :  { %630 = vmatpush.msra.mxu1 %v607_v43 }
 0x3f2   :  { %631 = vmatpush.msra.mxu1 %v606_v8 }
 0x3f4   :  { %632 = vmatpush.msra.mxu1 %v605_v23 }
 0x45e   :  { %v465_v21 = vpop.f32.mrf.mxu1 }
 0x45f   :  { %v466_v44 = vadd.f32 %v708_v27, %v465_v21  ;;  %v604_v21 = vld [vmem:[%s1131_s2 + $0x90] sm:$0xff] }
 0x460   :  { %633 = vmatpush.msra.mxu1 %v604_v21 }
 0x461   :  { %v1031_v13 = vadd.f32 %v466_v44, %v821_v0  ;;  %v603_v44 = vld [vmem:[%s1131_s2 + $0x88] sm:$0xff] }
 0x462   :  { %634 = vmatpush.msra.mxu1 %v603_v44 }
 0x463   :  { %v475_v25 = vsel %vm22_vm0, %v1031_v13, 0.0 }
 0x464   :  { %476 = vadd.xlane.f32.xlu2 %v475_v25 }
 0x466   :  { %v468_v45 = vpop.f32.mrf.mxu1 }
 0x467   :  { %v469_v46 = vadd.f32 %v708_v27, %v468_v45  ;;  %v711_v27 = vld [vmem:[%s1132_s3 + $0x20] ss:$0 sm:$0xff] }
 0x469   :  { %v1036_v29 = vadd.f32 %v469_v46, %v828_v2  ;;  %v602_v46 = vld [vmem:[%s1131_s2 + $0x80] sm:$0xff] }
 0x46a   :  { %635 = vmatpush.msra.mxu1 %v602_v46 }
 0x46b   :  { %v478_v47 = vsel %vm22_vm0, %v1036_v29, 0.0 }
 0x46c   :  { %479 = vadd.xlane.f32.xlu0 %v478_v47 }
 0x4d7   :  { %v477_v48 = vpop.xlane.xlu2 %476 }
 0x4d8   :  { %v481_v49 = vmul.f32 %v477_v48, %v832_v10 }
 0x4da   :  { %v483_v50 = vsub.f32 %v1031_v13, %v481_v49 }
 0x4dc   :  { %v485_v0 = vmul.f32 %v483_v50, %v483_v50 }
 0x4de   :  { %v487_v51 = vsel %vm22_vm0, %v485_v0, 0.0 }
 0x4df   :  { %488 = vadd.xlane.f32.xlu1 %v487_v51  ;;  %v480_v52 = vpop.xlane.xlu0 %479 }
 0x4e0   :  { %v482_v53 = vmul.f32 %v480_v52, %v832_v10 }
 0x4e2   :  { %v484_v54 = vsub.f32 %v1036_v29, %v482_v53 }
 0x4e4   :  { %v486_v2 = vmul.f32 %v484_v54, %v484_v54 }
 0x4e6   :  { %v490_v55 = vsel %vm22_vm0, %v486_v2, 0.0 }
 0x4e7   :  { %491 = vadd.xlane.f32.xlu2 %v490_v55 }
 0x552   :  { %v489_v60 = vpop.xlane.xlu1 %488 }
 0x553   :  { %v493_v61 = vmul.f32 %v489_v60, %v832_v10 }
 0x555   :  { %v495_v62 = vadd.f32 1e-05, %v493_v61 }
 0x557   :  { %751 = vrsqrt.f32 %v495_v62  ;;  %vm503_vm10 = vweird.f32 %v495_v62 }
 0x55a   :  { %v492_v63 = vpop.xlane.xlu2 %491 }
 0x55b   :  { %v494_v1 = vmul.f32 %v492_v63, %v832_v10 }
 0x55d   :  { %v752_v3 = vpop.eup %751  ;;  %v496_v4 = vadd.f32 1e-05, %v494_v1 }
 0x55e   :  { %v498_v5 = vmul.f32 %v752_v3, %v495_v62  ;;  %vm504_vm9 = vweird.f32 %v752_v3 }
 0x55f   :  { %753 = vrsqrt.f32 %v496_v4  ;;  %vm505_vm11 = vmor %vm503_vm10, %vm504_vm9  ;;  %vm513_vm13 = vweird.f32 %v496_v4 }
 0x560   :  { %v499_v6 = vmul.f32 %v752_v3, %v498_v5 }
 0x562   :  { %v500_v7 = vmul.f32 0.5, %v499_v6 }
 0x564   :  { %v501_v9 = vsub.f32 1.5, %v500_v7 }
 0x565   :  { %v754_v11 = vpop.eup %753 }
 0x566   :  { %v502_v12 = vmul.f32 %v752_v3, %v501_v9  ;;  %v508_v14 = vmul.f32 %v754_v11, %v496_v4  ;;  %vm514_vm12 = vweird.f32 %v754_v11 }
 0x567   :  { %vm515_vm14 = vmor %vm513_vm13, %vm514_vm12 }
 0x568   :  { %v506_v16 = vsel %vm505_vm11, %v752_v3, %v502_v12  ;;  %v509_v17 = vmul.f32 %v754_v11, %v508_v14 }
 0x569   :  { %v517_v10 = vmul.f32 %v506_v16, %v483_v50 }
 0x56a   :  { %v510_v20 = vmul.f32 0.5, %v509_v17 }
 0x56b   :  { %v520_v22 = vmul.f32 %v709_v15, %v517_v10  ;;  %v712_v10 = vld [vmem:[%s1131_s2 + $0x180] ss:$0 sm:$0xff]  ;;  %s791_s2 = smov 128  }
 0x56c   :  { %v511_v24 = vsub.f32 1.5, %v510_v20 }
 0x56d   :  { %v523_v26 = vadd.f32 %v710_v18, %v520_v22 }
 0x56e   :  { %v512_v28 = vmul.f32 %v754_v11, %v511_v24 }
 0x56f   :  { %691 = vmatmul.msk.f32.vlgmr.msrb.gmra.mxu2 %vm22_vm0, %v523_v26 }
 0x570   :  { %v516_v30 = vsel %vm515_vm14, %v754_v11, %v512_v28 }
 0x571   :  { %v518_v31 = vmul.f32 %v516_v30, %v484_v54 }
 0x573   :  { %v521_v32 = vmul.f32 %v709_v15, %v518_v31 }
 0x575   :  { %v524_v33 = vadd.f32 %v710_v18, %v521_v32 }
 0x577   :  { %692 = vmatmul.msk.f32.gmra.mxu2 %vm22_vm0, %v524_v33 }
 0x5f2   :  { %v554_v25 = vpop.f32.mrf.mxu2 }
 0x5f3   :  { %v555_v45 = vadd.f32 %v711_v27, %v554_v25 }
 0x5f5   :  { %v693_v47 = vmul.f32 -1.702, %v555_v45 }
 0x5f7   :  { %v564_v48 = vmul.f32 1.442695, %v693_v47 }
 0x5f9   :  { %755 = vpow2.f32 %v564_v48 }
 0x5fa   :  { %v557_v49 = vpop.f32.mrf.mxu2 }
 0x5fb   :  { %v558_v50 = vadd.f32 %v711_v27, %v557_v49 }
 0x5fd   :  { %v694_v0 = vmul.f32 -1.702, %v558_v50 }
 0x5ff   :  { %v756_v51 = vpop.eup %755  ;;  %v566_v52 = vmul.f32 1.442695, %v694_v0 }
 0x600   :  { %v568_v53 = vadd.f32 1.0, %v756_v51 }
 0x601   :  { %757 = vpow2.f32 %v566_v52 }
 0x602   :  { %759 = vrcp.f32 %v568_v53  ;;  %v581_v58 = vand.u32 2147483648, %v568_v53  ;;  %v579_v60 = vand.u32 2147483647, %v568_v53  ;;  %vm575_vm1 = vweird.f32 %v568_v53 }
 0x604   :  { %v582_v63 = vor.u32 1.1754944e-38, %v581_v58  ;;  %vm580_vm3 = vcmp.eq.f32.partialorder %v579_v60, 8.507059e+37 }
 0x607   :  { %v758_v54 = vpop.eup %757 }
 0x608   :  { %v760_v2 = vpop.eup %759  ;;  %v569_v55 = vadd.f32 1.0, %v758_v54 }
 0x609   :  { %v571_v56 = vmul.f32 %v760_v2, %v568_v53  ;;  %vm576_vm15 = vweird.f32 %v760_v2 }
 0x60a   :  { %761 = vrcp.f32 %v569_v55  ;;  %vm577_vm2 = vmor %vm575_vm1, %vm576_vm15  ;;  %v596_v7 = vand.u32 2147483648, %v569_v55  ;;  %v594_v11 = vand.u32 2147483647, %v569_v55  ;;  %vm590_vm5 = vweird.f32 %v569_v55 }
 0x60b   :  { %v572_v57 = vsub.f32 1.0, %v571_v56 }
 0x60c   :  { %v597_v14 = vor.u32 1.1754944e-38, %v596_v7  ;;  %vm595_vm7 = vcmp.eq.f32.partialorder %v594_v11, 8.507059e+37 }
 0x60d   :  { %v573_v59 = vmul.f32 %v760_v2, %v572_v57 }
 0x60f   :  { %v574_v61 = vadd.f32 %v760_v2, %v573_v59 }
 0x610   :  { %v762_v62 = vpop.eup %761 }
 0x611   :  { %v578_v1 = vsel %vm577_vm2, %v760_v2, %v574_v61  ;;  %v586_v3 = vmul.f32 %v762_v62, %v569_v55  ;;  %vm591_vm4 = vweird.f32 %v762_v62 }
 0x612   :  { %v583_v4 = vsel %vm580_vm3, %v582_v63, %v578_v1  ;;  %vm592_vm6 = vmor %vm590_vm5, %vm591_vm4 }
 0x613   :  { %v600_v5 = vmul.f32 %v583_v4, %v555_v45  ;;  %v587_v6 = vsub.f32 1.0, %v586_v3 }
 0x615   :  { %636 = vmatmul.f32.vlgmr.msra.gmra.mxu1 %v600_v5  ;;  %v588_v9 = vmul.f32 %v762_v62, %v587_v6 }
 0x617   :  { %v589_v12 = vadd.f32 %v762_v62, %v588_v9 }
 0x619   :  { %v593_v15 = vsel %vm592_vm6, %v762_v62, %v589_v12 }
 0x61a   :  { %v598_v16 = vsel %vm595_vm7, %v597_v14, %v593_v15 }
 0x61b   :  { %v601_v17 = vmul.f32 %v598_v16, %v558_v50 }
 0x61d   :  { %639 = vmatmul.f32.gmra.mxu1 %v601_v17 }
 0x692   :  { %v637_v18 = vpop.f32.mrf.mxu1 }
 0x693   :  { %v638_v20 = vadd.f32 %v712_v10, %v637_v18 }
 0x695   :  { %v643_v22 = vadd.f32 %v638_v20, %v1031_v13 }
 0x697   :  { %645 = vst.msk [vmem:[#allocation2] sm:$0xff] %vm22_vm0, %v643_v22 }
 0x69a   :  { %v640_v24 = vpop.f32.mrf.mxu1 }
 0x69b   :  { %v641_v26 = vadd.f32 %v712_v10, %v640_v24 }
 0x69d   :  { %v644_v28 = vadd.f32 %v641_v26, %v1036_v29 }
 0x69f   :  { %646 = vst.msk [vmem:[#allocation2 + $0x8] sm:$0xff] %vm22_vm0, %v644_v28 }
 0x6a0   :  { %659 = dma.vmem_to_hbm [thread:$0]  %s652_s5, 256, %s654_s8, [#allocation3], %s791_s2, %s791_s2, %s792_s9  }
 0x6a1   :  { %787 = dma.done.wait [#allocation3], 256  }
 0x6a2   :  { %788 = vsyncadd [#allocation3], 4294967040 }
 0x6a3   :  { %664 = vsyncpa [#allocation3], 1 }

</bundles_post_ra>
